<compile_context>
chip_gen: v7x
topology: tpu7x:2x2x1
jax: 0.10.0
libtpu: 0.0.40
codegen_flags: <defaults>
</compile_context>

<pallas_src>
import functools

import jax
import jax.numpy as jnp
import numpy as np
from jax.experimental import pallas as pl
from jax.experimental.pallas import tpu as pltpu

_LANE = 128
_NPAD = 8                 # encoder axis padded to 8 for the rank-1 noise matmuls
_VMEM_BUDGET = 6 << 20    # conservative single-K working-set budget (v7x-safe)


def _round_up(x, m):
    return (x + m - 1) // m * m


# ----------------------------------------------------------------------------
# Kernels
# ----------------------------------------------------------------------------
def _ql1_kernel_single(*refs, relu: bool, noisy: bool):
    """Single K block: out = relu?( x @ W_mu^T + (x @ EpsIn) @ EpsOut + b )."""
    if noisy:
        x_ref, w_ref, eps_in_ref, eps_out_ref, b_ref, o_ref = refs
    else:
        x_ref, w_ref, b_ref, o_ref = refs

    x = x_ref[...].astype(jnp.bfloat16)
    acc = jnp.dot(x, w_ref[...], preferred_element_type=jnp.float32)
    if noisy:
        r = jnp.dot(x, eps_in_ref[...], preferred_element_type=jnp.float32)
        acc = acc + jnp.dot(r.astype(jnp.bfloat16), eps_out_ref[...],
                            preferred_element_type=jnp.float32)
    out = acc + b_ref[...]
    if relu:
        out = jnp.maximum(out, 0.0)
    o_ref[...] = out.astype(o_ref.dtype)


def _ql1_kernel_multik(*refs, relu: bool, noisy: bool):
    """K-tiled fallback: accumulate into the resident f32 output block;
    rank-1 correction accumulated in a tiny scratch and applied at finalize."""
    if noisy:
        x_ref, w_ref, eps_in_ref, eps_out_ref, b_ref, o_ref, r_ref = refs
    else:
        x_ref, w_ref, b_ref, o_ref = refs

    k = pl.program_id(1)

    @pl.when(k == 0)
    def _():
        o_ref[...] = jnp.zeros_like(o_ref)
        if noisy:
            r_ref[...] = jnp.zeros_like(r_ref)

    x = x_ref[...].astype(jnp.bfloat16)
    o_ref[...] += jnp.dot(x, w_ref[...], preferred_element_type=jnp.float32)
    if noisy:
        r_ref[...] += jnp.dot(x, eps_in_ref[...],
                              preferred_element_type=jnp.float32)

    @pl.when(k == pl.num_programs(1) - 1)
    def _():
        out = o_ref[...] + b_ref[...]
        if noisy:
            out = out + jnp.dot(r_ref[...].astype(jnp.bfloat16),
                                eps_out_ref[...],
                                preferred_element_type=jnp.float32)
        if relu:
            out = jnp.maximum(out, 0.0)
        o_ref[...] = out


# ----------------------------------------------------------------------------
# Forward wrapper (hot path): reshape x, one pallas_call.
# ----------------------------------------------------------------------------
def ql1_head_forward(x_nchw, packed, *, relu: bool, noisy: bool, force_tk=None):
    lead = x_nchw.shape[:-3]
    D = int(np.prod(x_nchw.shape[-3:]))
    B = int(np.prod(lead)) if lead else 1
    x2d = x_nchw.reshape(B, D)                       # f32; cast to bf16 in-kernel

    w = packed["w_mu_t"]                             # [D_pad, O] bf16
    D_pad, O = w.shape
    if D_pad != D:                                   # zero cols are inert in the dot
        x2d = jnp.pad(x2d, ((0, 0), (0, D_pad - D)))
    b = packed["b_noisy"] if noisy else packed["b_mu"]   # [1, O] f32

    # ---- tile choices ----
    # M: split into >=2 tiles when B is big enough so the "parallel" axis can
    # be sharded across v7x's two TensorCores; at tiny B keep one tile.
    if B >= 16:
        tm = min(_round_up(pl.cdiv(B, 2), 8), 256)
    else:
        tm = B
    m_tiles = pl.cdiv(B, tm)

    # K: take the whole reduction in one block when the working set is small
    # (the common case for this head). Otherwise tile K; D is zero-padded to a
    # multiple of 128 at setup so edge blocks are never garbage.
    single_bytes = tm * D_pad * x2d.dtype.itemsize + D_pad * O * w.dtype.itemsize
    if force_tk is not None:
        tk = int(force_tk)
    elif single_bytes <= _VMEM_BUDGET:
        tk = D_pad
    else:
        tk = _LANE
        for cand in (2048, 1024, 512, 256):
            if D_pad % cand == 0:
                tk = cand
                break
    assert D_pad % tk == 0

    inputs = [x2d, w]
    if tk == D_pad:
        # ---------- single-K path (no accumulator, no pl.when, 1 K step) ----
        grid = (m_tiles,)
        in_specs = [pl.BlockSpec((tm, D_pad), lambda i: (i, 0)),
                    pl.BlockSpec((D_pad, O), lambda i: (0, 0))]   # W resident
        if noisy:
            in_specs += [pl.BlockSpec((D_pad, _NPAD), lambda i: (0, 0)),
                         pl.BlockSpec((_NPAD, O), lambda i: (0, 0))]
            inputs += [packed["eps_in_mat"], packed["eps_out_scaled"]]
        in_specs.append(pl.BlockSpec((1, O), lambda i: (0, 0)))
        inputs.append(b)
        out_specs = pl.BlockSpec((tm, O), lambda i: (i, 0))
        scratch_shapes = []
        kernel = functools.partial(_ql1_kernel_single, relu=relu, noisy=noisy)
        dim_sem = ("parallel",)
    else:
        # ---------- K-tiled fallback (large D only) -------------------------
        k_tiles = D_pad // tk
        grid = (m_tiles, k_tiles)
        in_specs = [pl.BlockSpec((tm, tk), lambda i, k: (i, k)),
                    pl.BlockSpec((tk, O), lambda i, k: (k, 0))]
        if noisy:
            in_specs += [pl.BlockSpec((tk, _NPAD), lambda i, k: (k, 0)),
                         pl.BlockSpec((_NPAD, O), lambda i, k: (0, 0))]
            inputs += [packed["eps_in_mat"], packed["eps_out_scaled"]]
        in_specs.append(pl.BlockSpec((1, O), lambda i, k: (0, 0)))
        inputs.append(b)
        out_specs = pl.BlockSpec((tm, O), lambda i, k: (i, 0))
        scratch_shapes = ([pltpu.VMEM((tm, _NPAD), jnp.float32)] if noisy else [])
        kernel = functools.partial(_ql1_kernel_multik, relu=relu, noisy=noisy)
        dim_sem = ("parallel", "arbitrary")

    out = pl.pallas_call(
        kernel,
        out_shape=jax.ShapeDtypeStruct((B, O), jnp.float32),
        grid_spec=pltpu.PrefetchScalarGridSpec(
            num_scalar_prefetch=0,
            grid=grid,
            in_specs=in_specs,
            out_specs=out_specs,
            scratch_shapes=scratch_shapes,
        ),
        compiler_params=pltpu.CompilerParams(dimension_semantics=dim_sem),
    )(*inputs)
    return out.reshape(lead + (O,)) if lead else out.reshape(O)


# ----------------------------------------------------------------------------
# Parameter setup (done ONCE): per-encoder NoisyLinear params + packed tensors.
# On a noise refresh only eps_in_mat / eps_out_scaled / b_noisy (tiny) change.
# ----------------------------------------------------------------------------
def _factorized_noise(key, n):
    e = jax.random.normal(key, (n,), dtype=jnp.float32)
    return jnp.sign(e) * jnp.sqrt(jnp.abs(e))


def make_ql1_head_params(key, in_features, out_features_list):
    n_enc = len(out_features_list)
    assert n_enc <= _NPAD
    keys = jax.random.split(key, n_enc)
    bound = 1.0 / np.sqrt(in_features)
    sigma0 = 0.5 / np.sqrt(in_features)

    encoders = []
    for k_e, of in zip(keys, out_features_list):
        k_mu_w, k_mu_b, k_in, k_out = jax.random.split(k_e, 4)
        encoders.append(dict(
            w_mu=jax.random.uniform(k_mu_w, (of, in_features),
                                    minval=-bound, maxval=bound,
                                    dtype=jnp.float32),
            b_mu=jax.random.uniform(k_mu_b, (of,),
                                    minval=-bound, maxval=bound,
                                    dtype=jnp.float32),
            sigma0=sigma0,
            eps_in=_factorized_noise(k_in, in_features),
            eps_out=_factorized_noise(k_out, of),
        ))

    O = int(sum(out_features_list))
    D_pad = _round_up(in_features, _LANE)

    # Pre-transposed + concatenated mean weights, bf16; padded rows are zero.
    w_mu_t = jnp.concatenate([e["w_mu"].T for e in encoders], axis=1)   # [D, O]
    w_mu_t = jnp.pad(w_mu_t, ((0, D_pad - in_features), (0, 0)))
    w_mu_t = w_mu_t.astype(jnp.bfloat16)                                # [D_pad, O]

    b_mu = jnp.concatenate([e["b_mu"] for e in encoders], axis=0)[None, :]
    b_noisy = jnp.concatenate(
        [e["b_mu"] + e["sigma0"] * e["eps_out"] for e in encoders],
        axis=0)[None, :]

    # Rank-1 noise factors (W_sigma == sigma0 constant): W_eff = W_mu + sigma0 *
    # outer(eps_out, eps_in)  ->  x @ W_eff^T = x @ W_mu^T + (x @ EpsIn) @ EpsOut.
    eps_in_mat = jnp.zeros((D_pad, _NPAD), jnp.float32)
    rows = []
    off = 0
    for idx, e in enumerate(encoders):
        eps_in_mat = eps_in_mat.at[:in_features, idx].set(e["eps_in"])
        row = jnp.zeros((O,), jnp.float32)
        row = row.at[off:off + e["eps_out"].shape[0]].set(
            e["sigma0"] * e["eps_out"])
        rows.append(row)
        off += e["eps_out"].shape[0]
    rows += [jnp.zeros((O,), jnp.float32)] * (_NPAD - n_enc)

    packed = dict(
        w_mu_t=w_mu_t,                                              # [D_pad, O] bf16
        b_mu=b_mu.astype(jnp.float32),                              # [1, O]
        b_noisy=b_noisy.astype(jnp.float32),                        # [1, O]
        eps_in_mat=eps_in_mat.astype(jnp.bfloat16),                 # [D_pad, 8]
        eps_out_scaled=jnp.stack(rows, axis=0).astype(jnp.bfloat16),  # [8, O]
    )
    return packed, encoders


# ----------------------------------------------------------------------------
# Pure-JAX f32 reference of the PyTorch forward (correctness check).
# ----------------------------------------------------------------------------
def ql1_head_reference(x_nchw, encoders, *, relu: bool, noisy: bool):
    B = x_nchw.shape[0]
    D = int(np.prod(x_nchw.shape[-3:]))
    xf = x_nchw.reshape(B, D)
    reps = []
    for e in encoders:
        if noisy:
            w_eff = e["w_mu"] + e["sigma0"] * jnp.outer(e["eps_out"], e["eps_in"])
            b_eff = e["b_mu"] + e["sigma0"] * e["eps_out"]
        else:
            w_eff, b_eff = e["w_mu"], e["b_mu"]
        reps.append(xf @ w_eff.T + b_eff)
    rep = jnp.concatenate(reps, axis=-1)
    if relu:
        rep = jnp.maximum(rep, 0.0)
    return rep


if __name__ == "__main__":
    # Mirrors QL1Head(head, dueling=True, type='noisy value advantage relu'):
    # two NoisyLinear encoders, noise forced ON, trailing ReLU.
    B, C, H, W = 2, 4, 16, 16
    D = C * H * W                       # 1024 after flatten(-3, -1)
    OUT_FEATURES = (32, 32)             # out_features of the two encoders

    key = jax.random.PRNGKey(0)
    k_x, k_p = jax.random.split(key)
    x = jax.random.normal(k_x, (B, C, H, W), dtype=jnp.float32)
    packed, encoders = make_ql1_head_params(k_p, D, OUT_FEATURES)

    # 1) Hot path: noisy + relu, single-K fused kernel (grid = (1,)).
    out = jax.block_until_ready(
        ql1_head_forward(x, packed, relu=True, noisy=True))
    ref = ql1_head_reference(x, encoders, relu=True, noisy=True)
    np.testing.assert_allclose(np.asarray(out), np.asarray(ref),
                               rtol=2e-2, atol=2e-2)
    assert out.shape == (B, sum(OUT_FEATURES))

    # 2) K-tiled fallback path (exercised by forcing tk < D).
    out_kt = jax.block_until_ready(
        ql1_head_forward(x, packed, relu=True, noisy=True, force_tk=256))
    np.testing.assert_allclose(np.asarray(out_kt), np.asarray(ref),
                               rtol=2e-2, atol=2e-2)

    # 3) Non-noisy / non-relu variant.
    out_nn = jax.block_until_ready(
        ql1_head_forward(x, packed, relu=False, noisy=False))
    ref_nn = ql1_head_reference(x, encoders, relu=False, noisy=False)
    np.testing.assert_allclose(np.asarray(out_nn), np.asarray(ref_nn),
                               rtol=2e-2, atol=2e-2)

    print("KERNEL_OK")
</pallas_src>

<mosaic_0001>
module attributes {stable_mosaic.version = 11 : i64} {
  func.func @_ql1_kernel_single(%arg0: i32, %arg1: memref<2x1024xf32, #tpu.memory_space<vmem>>, %arg2: memref<1024x64xbf16, #tpu.memory_space<vmem>>, %arg3: memref<1024x8xbf16, #tpu.memory_space<vmem>>, %arg4: memref<8x64xbf16, #tpu.memory_space<vmem>>, %arg5: memref<1x64xf32, #tpu.memory_space<vmem>>, %arg6: memref<2x64xf32, #tpu.memory_space<vmem>>) attributes {dimension_semantics = [#tpu.dimension_semantics<parallel>], iteration_bounds = array<i64: 1>, scalar_prefetch = 0 : i64, scratch_operands = 0 : i64, tpu.core_type = #tpu.core_type<tc>, window_params = [{transform_indices = @transform_0, window_bounds = array<i64: 2, 1024>}, {pipeline_mode = #tpu.pipeline_mode<synchronous>, transform_indices = @transform_1, window_bounds = array<i64: 1024, 64>}, {pipeline_mode = #tpu.pipeline_mode<synchronous>, transform_indices = @transform_2, window_bounds = array<i64: 1024, 8>}, {pipeline_mode = #tpu.pipeline_mode<synchronous>, transform_indices = @transform_3, window_bounds = array<i64: 8, 64>}, {pipeline_mode = #tpu.pipeline_mode<synchronous>, transform_indices = @transform_4, window_bounds = array<i64: 1, 64>}, {transform_indices = @transform_5, window_bounds = array<i64: 2, 64>}]} {
    %c0 = arith.constant 0 : index
    %c0_0 = arith.constant 0 : index
    %0 = vector.load %arg1[%c0, %c0_0] : memref<2x1024xf32, #tpu.memory_space<vmem>>, vector<2x1024xf32>
    %1 = arith.truncf %0 : vector<2x1024xf32> to vector<2x1024xbf16>
    %c0_1 = arith.constant 0 : index
    %c0_2 = arith.constant 0 : index
    %2 = vector.load %arg2[%c0_1, %c0_2] : memref<1024x64xbf16, #tpu.memory_space<vmem>>, vector<1024x64xbf16>
    %cst = arith.constant dense<0.000000e+00> : vector<2x64xf32>
    %3 = tpu.matmul %1, %2, %cst {dimension_numbers = #tpu.dot_dimension_numbers<[1], [0], [0], [1], [0, 0, 1, 1], [], []>} : vector<2x1024xbf16>, vector<1024x64xbf16>, vector<2x64xf32> -> vector<2x64xf32>
    %c0_3 = arith.constant 0 : index
    %c0_4 = arith.constant 0 : index
    %4 = vector.load %arg3[%c0_3, %c0_4] : memref<1024x8xbf16, #tpu.memory_space<vmem>>, vector<1024x8xbf16>
    %cst_5 = arith.constant dense<0.000000e+00> : vector<2x8xf32>
    %5 = tpu.matmul %1, %4, %cst_5 {dimension_numbers = #tpu.dot_dimension_numbers<[1], [0], [0], [1], [0, 0, 1, 1], [], []>} : vector<2x1024xbf16>, vector<1024x8xbf16>, vector<2x8xf32> -> vector<2x8xf32>
    %6 = arith.truncf %5 : vector<2x8xf32> to vector<2x8xbf16>
    %c0_6 = arith.constant 0 : index
    %c0_7 = arith.constant 0 : index
    %7 = vector.load %arg4[%c0_6, %c0_7] : memref<8x64xbf16, #tpu.memory_space<vmem>>, vector<8x64xbf16>
    %cst_8 = arith.constant dense<0.000000e+00> : vector<2x64xf32>
    %8 = tpu.matmul %6, %7, %cst_8 {dimension_numbers = #tpu.dot_dimension_numbers<[1], [0], [0], [1], [0, 0, 1, 1], [], []>} : vector<2x8xbf16>, vector<8x64xbf16>, vector<2x64xf32> -> vector<2x64xf32>
    %9 = arith.addf %3, %8 : vector<2x64xf32>
    %c0_9 = arith.constant 0 : index
    %c0_10 = arith.constant 0 : index
    %10 = vector.load %arg5[%c0_9, %c0_10] : memref<1x64xf32, #tpu.memory_space<vmem>>, vector<1x64xf32>
    %11 = vector.broadcast %10 : vector<1x64xf32> to vector<2x64xf32>
    %12 = arith.addf %9, %11 : vector<2x64xf32>
    %cst_11 = arith.constant 0.000000e+00 : f32
    %13 = vector.broadcast %cst_11 : f32 to vector<2x64xf32>
    %14 = arith.maximumf %12, %13 : vector<2x64xf32>
    %c0_12 = arith.constant 0 : index
    %c0_13 = arith.constant 0 : index
    %15 = vector.load %arg6[%c0_12, %c0_13] : memref<2x64xf32, #tpu.memory_space<vmem>>, vector<2x64xf32>
    tpu.vector_store %arg6[%c0_12, %c0_13], %14 {strides = array<i32>} : memref<2x64xf32, #tpu.memory_space<vmem>>, vector<2x64xf32>,
    return
  }
  func.func @transform_0(%arg0: i32) -> (i32, i32) {
    %c0_i32 = arith.constant 0 : i32
    %c0_i32_0 = arith.constant 0 : i32
    return %arg0, %c0_i32 : i32, i32
  }
  func.func @transform_1(%arg0: i32) -> (i32, i32) {
    %c0_i32 = arith.constant 0 : i32
    %c0_i32_0 = arith.constant 0 : i32
    %c0_i32_1 = arith.constant 0 : i32
    return %c0_i32, %c0_i32_0 : i32, i32
  }
  func.func @transform_2(%arg0: i32) -> (i32, i32) {
    %c0_i32 = arith.constant 0 : i32
    %c0_i32_0 = arith.constant 0 : i32
    %c0_i32_1 = arith.constant 0 : i32
    return %c0_i32, %c0_i32_0 : i32, i32
  }
  func.func @transform_3(%arg0: i32) -> (i32, i32) {
    %c0_i32 = arith.constant 0 : i32
    %c0_i32_0 = arith.constant 0 : i32
    %c0_i32_1 = arith.constant 0 : i32
    return %c0_i32, %c0_i32_0 : i32, i32
  }
  func.func @transform_4(%arg0: i32) -> (i32, i32) {
    %c0_i32 = arith.constant 0 : i32
    %c0_i32_0 = arith.constant 0 : i32
    %c0_i32_1 = arith.constant 0 : i32
    return %c0_i32, %c0_i32_0 : i32, i32
  }
  func.func @transform_5(%arg0: i32) -> (i32, i32) {
    %c0_i32 = arith.constant 0 : i32
    %c0_i32_0 = arith.constant 0 : i32
    return %arg0, %c0_i32 : i32, i32
  }
}

</mosaic_0001>

<bundles_post_ra>
// kernel: tpu_custom_call.1
= control target key start
LH: loop header
LB: loop body
LE: loop exit
PB: predicated region body
PF: predicated region fallthrough
CT: control target
= control target key end

     0   :  { %v30_v28 = vlaneseq  ;;  %v1967_v36 = vmov 1983009808   ;;  %s2443_s0 = inlined_call_operand.vmem [shape: f32[2,1024], index: 0, kind: input, shape index: {}]   ;;  %s2444_s1 = inlined_call_operand.vmem [shape: bf16[1024,64], index: 1, kind: input, shape index: {}]   ;;  %s2445_s2 = inlined_call_operand.vmem [shape: bf16[1024,8], index: 2, kind: input, shape index: {}]   ;;  %s2446_s3 = inlined_call_operand.vmem [shape: bf16[8,64], index: 3, kind: input, shape index: {}]   ;;  %s2447_s4 = inlined_call_operand.vmem [shape: f32[1,64], index: 4, kind: input, shape index: {}]   ;;  %s2448_s5 = inlined_call_operand.hbm [shape: f32[2,64], index: 5, kind: output, shape index: {}]  }
   0x1   :  { %v1813_v0 = vld [vmem:[%s2445_s2 + $0x40] sm:$0xff]   ;;  %v1817_v4 = vld [vmem:[%s2445_s2 + $0x48] sm:$0xff]   ;;  %v1821_v8 = vld [vmem:[%s2445_s2 + $0x50] sm:$0xff]   ;;  %v28_v37 = vunpack.c.l.s4 %v1967_v36 }
   0x2   :  { %v1814_v1 = vld [vmem:[%s2445_s2 + $0xc0] sm:$0xff]   ;;  %1625 = vmatprep.subr.bf16.mxu0 %v1813_v0  ;;  %v1818_v5 = vld [vmem:[%s2445_s2 + $0xc8] sm:$0xff]   ;;  %v1822_v9 = vld [vmem:[%s2445_s2 + $0xd0] sm:$0xff]   ;;  %v31_v33 = vshrl.u32 %v30_v28, 7 }
   0x3   :  { %v1815_v2 = vld [vmem:[%s2445_s2] sm:$0xff]   ;;  %1647 = vmatprep.subr.bf16.mxu1 %v1814_v1  ;;  %v1819_v6 = vld [vmem:[%s2445_s2 + $0x8] sm:$0xff]   ;;  %v1823_v10 = vld [vmem:[%s2445_s2 + $0x10] sm:$0xff]   ;;  %v29_v39 = vunpack.c.0.s8 %v28_v37 }
   0x4   :  { %v1816_v3 = vld [vmem:[%s2445_s2 + $0x80] sm:$0xff]   ;;  %1626 = vmatpush3.bf16.msra.mxu0 %v1815_v2  ;;  %v1820_v7 = vld [vmem:[%s2445_s2 + $0x88] sm:$0xff]   ;;  %v1824_v11 = vld [vmem:[%s2445_s2 + $0x90] sm:$0xff]  }
   0x5   :  { %1648 = vmatpush3.bf16.msra.mxu1 %v1816_v3  ;;  %1627 = vmatprep.subr.bf16.mxu0 %v1817_v4  ;;  %v1825_v12 = vld [vmem:[%s2445_s2 + $0x58] sm:$0xff]   ;;  %v1829_v16 = vld [vmem:[%s2445_s2 + $0x60] sm:$0xff]   ;;  %v1833_v20 = vld [vmem:[%s2445_s2 + $0x68] sm:$0xff]   ;;  %v2106_v41 = vsub.s32 %v29_v39, %v31_v33 }
   0x6   :  { %1649 = vmatprep.subr.bf16.mxu1 %v1818_v5  ;;  %v1826_v13 = vld [vmem:[%s2445_s2 + $0xd8] sm:$0xff]   ;;  %v1830_v17 = vld [vmem:[%s2445_s2 + $0xe0] sm:$0xff]   ;;  %v1834_v21 = vld [vmem:[%s2445_s2 + $0xe8] sm:$0xff]  }
   0x7   :  { %v1827_v14 = vld [vmem:[%s2445_s2 + $0x18] sm:$0xff]   ;;  %v1831_v18 = vld [vmem:[%s2445_s2 + $0x20] sm:$0xff]   ;;  %v1835_v22 = vld [vmem:[%s2445_s2 + $0x28] sm:$0xff]  }
   0x8   :  { %1628 = vmatpush3.bf16.msra.mxu0 %v1819_v6  ;;  %v1828_v15 = vld [vmem:[%s2445_s2 + $0x98] sm:$0xff]   ;;  %v1832_v19 = vld [vmem:[%s2445_s2 + $0xa0] sm:$0xff]   ;;  %v1836_v23 = vld [vmem:[%s2445_s2 + $0xa8] sm:$0xff]  }
   0x9   :  { %1650 = vmatpush3.bf16.msra.mxu1 %v1820_v7  ;;  %1629 = vmatprep.subr.bf16.mxu0 %v1821_v8  ;;  %v1837_v24 = vld [vmem:[%s2445_s2 + $0x70] sm:$0xff]   ;;  %v1841_v29 = vld [vmem:[%s2445_s2 + $0x78] sm:$0xff]   ;;  %v22_v34 = vld [vmem:[%s2443_s0] sm:$0xff] }
   0xa   :  { %1651 = vmatprep.subr.bf16.mxu1 %v1822_v9  ;;  %v1838_v25 = vld [vmem:[%s2445_s2 + $0xf0] sm:$0xff]   ;;  %v1842_v30 = vld [vmem:[%s2445_s2 + $0xf8] sm:$0xff]   ;;  %v1846_v35 = vld [vmem:[%s2445_s2 + $0x140] sm:$0xff]   ;;  %v26_v40 = vcombine.high %v22_v34, %v22_v34  ;;  %v33_v42 = vrot.slane %v22_v34, %v2106_v41 }
   0xb   :  { %v1839_v26 = vld [vmem:[%s2445_s2 + $0x30] sm:$0xff]   ;;  %v1843_v31 = vld [vmem:[%s2445_s2 + $0x38] sm:$0xff]   ;;  %v1847_v38 = vld [vmem:[%s2445_s2 + $0x1c0] sm:$0xff]  }
   0xc   :  { %1630 = vmatpush3.bf16.msra.mxu0 %v1823_v10  ;;  %v1840_v27 = vld [vmem:[%s2445_s2 + $0xb0] sm:$0xff]   ;;  %v1844_v32 = vld [vmem:[%s2445_s2 + $0xb8] sm:$0xff]   ;;  %v40_v43 = vrot.slane %v26_v40, %v2106_v41  ;;  %v41_v44 = vcombine.high %v33_v42, %v33_v42  ;;  %v1848_v46 = vld [vmem:[%s2445_s2 + $0x100] sm:$0xff]   ;;  %v2113_v47 = vpack.c.bf16 %v33_v42, %v33_v42 }
   0xd   :  { %1652 = vmatpush3.bf16.msra.mxu1 %v1824_v11  ;;  %1631 = vmatprep.subr.bf16.mxu0 %v1825_v12  ;;  %v1849_v49 = vld [vmem:[%s2445_s2 + $0x180] sm:$0xff]   ;;  %v1850_v52 = vld [vmem:[%s2445_s2 + $0x148] sm:$0xff]   ;;  %v1854_v56 = vld [vmem:[%s2445_s2 + $0x150] sm:$0xff]  }
   0xe   :  { %1653 = vmatprep.subr.bf16.mxu1 %v1826_v13  ;;  %v42_v45 = vcombine.high %v40_v43, %v40_v43  ;;  %v2115_v48 = vpack.c.bf16 %v40_v43, %v40_v43  ;;  %v2120_v50 = vpack.c.bf16 %v41_v44, %v41_v44  ;;  %v1851_v53 = vld [vmem:[%s2445_s2 + $0x1c8] sm:$0xff]   ;;  %v1855_v57 = vld [vmem:[%s2445_s2 + $0x1d0] sm:$0xff]   ;;  %v1858_v60 = vld [vmem:[%s2445_s2 + $0x158] sm:$0xff]  }
   0xf   :  { %v1852_v54 = vld [vmem:[%s2445_s2 + $0x108] sm:$0xff]   ;;  %v1856_v58 = vld [vmem:[%s2445_s2 + $0x110] sm:$0xff]   ;;  %v1859_v61 = vld [vmem:[%s2445_s2 + $0x1d8] sm:$0xff]  }
  0x10   :  { %1632 = vmatpush3.bf16.msra.mxu0 %v1827_v14  ;;  %v2122_v51 = vpack.c.bf16 %v42_v45, %v42_v45  ;;  %748 = vmatprep.mubr.bf16.mxu0 %v2120_v50  ;;  %v1853_v55 = vld [vmem:[%s2445_s2 + $0x188] sm:$0xff]   ;;  %v1857_v59 = vld [vmem:[%s2445_s2 + $0x190] sm:$0xff]   ;;  %v1860_v62 = vld [vmem:[%s2445_s2 + $0x118] sm:$0xff]  }
  0x11   :  { %1654 = vmatpush3.bf16.msra.mxu1 %v1828_v15  ;;  %1633 = vmatprep.subr.bf16.mxu0 %v1829_v16  ;;  %v1861_v63 = vld [vmem:[%s2445_s2 + $0x198] sm:$0xff]   ;;  %v1862_v0 = vld [vmem:[%s2445_s2 + $0x160] sm:$0xff]   ;;  %v1866_v4 = vld [vmem:[%s2445_s2 + $0x168] sm:$0xff]  }
  0x12   :  { %1655 = vmatprep.subr.bf16.mxu1 %v1830_v17  ;;  %788 = vmatprep.mubr.bf16.mxu1 %v2122_v51  ;;  %v1863_v1 = vld [vmem:[%s2445_s2 + $0x1e0] sm:$0xff]   ;;  %v1867_v5 = vld [vmem:[%s2445_s2 + $0x1e8] sm:$0xff]   ;;  %v1870_v8 = vld [vmem:[%s2445_s2 + $0x170] sm:$0xff]  }
  0x13   :  { %v1864_v2 = vld [vmem:[%s2445_s2 + $0x120] sm:$0xff]   ;;  %v1868_v6 = vld [vmem:[%s2445_s2 + $0x128] sm:$0xff]   ;;  %v1871_v9 = vld [vmem:[%s2445_s2 + $0x1f0] sm:$0xff]  }
  0x14   :  { %1634 = vmatpush3.bf16.msra.mxu0 %v1831_v18  ;;  %v1865_v3 = vld [vmem:[%s2445_s2 + $0x1a0] sm:$0xff]   ;;  %v1869_v7 = vld [vmem:[%s2445_s2 + $0x1a8] sm:$0xff]   ;;  %v1872_v11 = vld [vmem:[%s2445_s2 + $0x130] sm:$0xff]  }
  0x15   :  { %1656 = vmatpush3.bf16.msra.mxu1 %v1832_v19  ;;  %1635 = vmatprep.subr.bf16.mxu0 %v1833_v20  ;;  %v23_v10 = vld [vmem:[%s2443_s0 + $0x8] sm:$0xff]  ;;  %v1873_v12 = vld [vmem:[%s2445_s2 + $0x1b0] sm:$0xff]   ;;  %v1874_v15 = vld [vmem:[%s2445_s2 + $0x178] sm:$0xff]  }
  0x16   :  { %1657 = vmatprep.subr.bf16.mxu1 %v1834_v21  ;;  %v50_v13 = vrot.slane %v23_v10, %v2106_v41  ;;  %v43_v14 = vcombine.high %v23_v10, %v23_v10  ;;  %v1875_v16 = vld [vmem:[%s2445_s2 + $0x1f8] sm:$0xff]  }
  0x17   :  { %v1876_v19 = vld [vmem:[%s2445_s2 + $0x138] sm:$0xff]  }
  0x18   :  { %1636 = vmatpush3.bf16.msra.mxu0 %v1835_v22  ;;  %v58_v17 = vcombine.high %v50_v13, %v50_v13  ;;  %v57_v18 = vrot.slane %v43_v14, %v2106_v41  ;;  %v1877_v20 = vld [vmem:[%s2445_s2 + $0x1b8] sm:$0xff]  }
  0x19   :  { %1658 = vmatpush3.bf16.msra.mxu1 %v1836_v23  ;;  %1637 = vmatprep.subr.bf16.mxu0 %v1837_v24  ;;  %v2220_v24 = vpack.c.bf16 %v50_v13, %v50_v13 }
  0x1a   :  { %1659 = vmatprep.subr.bf16.mxu1 %v1838_v25  ;;  %v73_v21 = vpack.c.bf16 %v58_v17, %v58_v17  ;;  %v59_v22 = vcombine.high %v57_v18, %v57_v18  ;;  %v2222_v25 = vpack.c.bf16 %v57_v18, %v57_v18 }
  0x1c   :  { %1638 = vmatpush3.bf16.msra.mxu0 %v1839_v26  ;;  %v2217_v23 = vpack.c.bf16 %v59_v22, %v59_v22 }
  0x1d   :  { %1660 = vmatpush3.bf16.msra.mxu1 %v1840_v27  ;;  %1639 = vmatprep.subr.bf16.mxu0 %v1841_v29 }
  0x1e   :  { %1661 = vmatprep.subr.bf16.mxu1 %v1842_v30 }
  0x20   :  { %1640 = vmatpush3.bf16.msra.mxu0 %v1843_v31 }
  0x21   :  { %1662 = vmatpush3.bf16.msra.mxu1 %v1844_v32  ;;  %1669 = vmatprep.subr.bf16.mxu0 %v1846_v35 }
  0x22   :  { %1691 = vmatprep.subr.bf16.mxu1 %v1847_v38 }
  0x23   :  { %749 = vmatmul.mubr.bf16.vlgmr.msra.gmra.mrb[0].mxu0 %v2113_v47 }
  0x24   :  { %789 = vmatmul.mubr.bf16.vlgmr.msra.gmra.mrb[0].mxu1 %v2115_v48  ;;  %1670 = vmatpush3.bf16.msra.mxu0 %v1848_v46 }
  0x25   :  { %1692 = vmatpush3.bf16.msra.mxu1 %v1849_v49  ;;  %1671 = vmatprep.subr.bf16.mxu0 %v1850_v52 }
  0x26   :  { %1693 = vmatprep.subr.bf16.mxu1 %v1851_v53  ;;  %828 = vmatprep.mubr.bf16.mxu0 %v73_v21 }
  0x27   :  { %868 = vmatprep.mubr.bf16.mxu1 %v2217_v23 }
  0x28   :  { %1672 = vmatpush3.bf16.msra.mxu0 %v1852_v54 }
  0x29   :  { %1694 = vmatpush3.bf16.msra.mxu1 %v1853_v55  ;;  %1673 = vmatprep.subr.bf16.mxu0 %v1854_v56 }
  0x2a   :  { %1695 = vmatprep.subr.bf16.mxu1 %v1855_v57 }
  0x2c   :  { %1674 = vmatpush3.bf16.msra.mxu0 %v1856_v58 }
  0x2d   :  { %1696 = vmatpush3.bf16.msra.mxu1 %v1857_v59  ;;  %1675 = vmatprep.subr.bf16.mxu0 %v1858_v60 }
  0x2e   :  { %1697 = vmatprep.subr.bf16.mxu1 %v1859_v61 }
  0x30   :  { %1676 = vmatpush3.bf16.msra.mxu0 %v1860_v62 }
  0x31   :  { %1698 = vmatpush3.bf16.msra.mxu1 %v1861_v63  ;;  %1677 = vmatprep.subr.bf16.mxu0 %v1862_v0 }
  0x32   :  { %1699 = vmatprep.subr.bf16.mxu1 %v1863_v1 }
  0x34   :  { %1678 = vmatpush3.bf16.msra.mxu0 %v1864_v2 }
  0x35   :  { %1700 = vmatpush3.bf16.msra.mxu1 %v1865_v3  ;;  %1679 = vmatprep.subr.bf16.mxu0 %v1866_v4 }
  0x36   :  { %1701 = vmatprep.subr.bf16.mxu1 %v1867_v5 }
  0x38   :  { %1680 = vmatpush3.bf16.msra.mxu0 %v1868_v6 }
  0x39   :  { %1702 = vmatpush3.bf16.msra.mxu1 %v1869_v7  ;;  %1681 = vmatprep.subr.bf16.mxu0 %v1870_v8 }
  0x3a   :  { %1703 = vmatprep.subr.bf16.mxu1 %v1871_v9 }
  0x3c   :  { %1682 = vmatpush3.bf16.msra.mxu0 %v1872_v11 }
  0x3d   :  { %1704 = vmatpush3.bf16.msra.mxu1 %v1873_v12  ;;  %1683 = vmatprep.subr.bf16.mxu0 %v1874_v15 }
  0x3e   :  { %1705 = vmatprep.subr.bf16.mxu1 %v1875_v16 }
  0x40   :  { %1684 = vmatpush3.bf16.msra.mxu0 %v1876_v19 }
  0x41   :  { %1706 = vmatpush3.bf16.msra.mxu1 %v1877_v20 }
  0x43   :  { %829 = vmatmul.mubr.bf16.vlgmr.msra.gmra.mrb[4].mxu0 %v2220_v24 }
  0x44   :  { %869 = vmatmul.mubr.bf16.vlgmr.msra.gmra.mrb[4].mxu1 %v2222_v25 }
  0x45   :  { %1342 = vmatprep.mubr.bf16.mxu1 %v2120_v50 }
  0x46   :  { %10 = vsyncpa [#allocation3], 0  ;;  %v1879_v26 = vld [vmem:[%s2444_s1 + $0x40] sm:$0xff]   ;;  %v1881_v28 = vld [vmem:[%s2444_s1 + $0x48] sm:$0xff]   ;;  %vm882_vm0 = vcmask 1043456   ;;  %v1968_v43 = vmov 0.0  }
  0x47   :  { %v1880_v27 = vld [vmem:[%s2444_s1] sm:$0xff]   ;;  %1715 = vmatprep.subr.bf16.mxu1 %v1879_v26  ;;  %v1882_v29 = vld [vmem:[%s2444_s1 + $0x8] sm:$0xff]   ;;  %v1883_v30 = vld [vmem:[%s2444_s1 + $0x50] sm:$0xff]   ;;  %1803 = vmatprep.subr.bf16.mxu0 %v1968_v43  ;;  %vm1969_vm1 = vmmov 0   ;;  %vm878_vm2 = vcmask 64512   ;;  %s1970_s17 = smov [#allocation2]  }
  0x48   :  { %1716 = vmatpush3.bf16.msra.mxu1 %v1880_v27  ;;  %v1884_v31 = vld [vmem:[%s2444_s1 + $0x10] sm:$0xff]   ;;  %v1885_v32 = vld [vmem:[%s2444_s1 + $0x58] sm:$0xff]   ;;  %v1887_v34 = vld [vmem:[%s2444_s1 + $0x60] sm:$0xff]   ;;  %1805 = vmatprep.mubr.msk.bf16.mxu0 %vm1969_vm1, %v1968_v43  ;;  %s1487_s18 = sshll.u32 %s1970_s17, 4  ;;  %vm1479_vm3 = vcmask 517120   ;;  %s1488_s18 = int_to_ptr.vmem [resolvable:$true] %s1487_s18 }
  0x49   :  { %1717 = vmatprep.subr.bf16.mxu1 %v1881_v28  ;;  %v1886_v33 = vld [vmem:[%s2444_s1 + $0x18] sm:$0xff]   ;;  %v1888_v35 = vld [vmem:[%s2444_s1 + $0x20] sm:$0xff]   ;;  %v1889_v36 = vld [vmem:[%s2444_s1 + $0x68] sm:$0xff]   ;;  %s1943_s19 = scalar_lea.vmem %s1488_s18, 32  ;;  %p1948_p1 = scmp.lt.s32.totalorder %s1488_s18, %s1488_s18 }
  0x4a   :  { %v1890_v37 = vld [vmem:[%s2444_s1 + $0x28] sm:$0xff]   ;;  %v1891_v38 = vld [vmem:[%s2444_s1 + $0x70] sm:$0xff]   ;;  %v1893_v40 = vld [vmem:[%s2444_s1 + $0x78] sm:$0xff]   ;;  %p1944_p0 = scmp.ne.s32.totalorder %s1488_s18, %s1943_s19  ;;  %p1949_p2 = scmp.lt.s32.totalorder %s1943_s19, %s1943_s19 }
  0x4b   :  { %v1892_v39 = vld [vmem:[%s2444_s1 + $0x30] sm:$0xff]   ;;  %v1894_v41 = vld [vmem:[%s2444_s1 + $0x38] sm:$0xff]   ;;  %v877_v42 = vld [vmem:[%s2446_s3] sm:$0xf] }
  0x4c   :  { %1718 = vmatpush3.bf16.msra.mxu1 %v1882_v29  ;;  %v884_v44 = vsel %vm882_vm0, %v877_v42, 0  ;;  %v1895_v45 = vld [vmem:[%s2444_s1 + $0xc0] sm:$0xff]   ;;  %v1902_v50 = vld [vmem:[%s2444_s1 + $0x108] sm:$0xff]   ;;  %v1905_v52 = vld [vmem:[%s2444_s1 + $0x150] sm:$0xff]   ;;  %p1950_p3 = por %p1949_p2, %p1948_p1 }
  0x4d   :  { %1719 = vmatprep.subr.bf16.mxu1 %v1883_v30  ;;  %1804 = vmatpush3.bf16.msra.mxu0 %v884_v44  ;;  %v1897_v46 = vld [vmem:[%s2444_s1 + $0x140] sm:$0xff]   ;;  %v1906_v53 = vld [vmem:[%s2444_s1 + $0x110] sm:$0xff]   ;;  %v1909_v54 = vld [vmem:[%s2444_s1 + $0x158] sm:$0xff]  }
  0x4e   :  { %1737 = vmatprep.subr.bf16.mxu0 %v1895_v45  ;;  %v1898_v49 = vld [vmem:[%s2444_s1 + $0x100] sm:$0xff]   ;;  %v1910_v55 = vld [vmem:[%s2444_s1 + $0x118] sm:$0xff]   ;;  %v1917_v58 = vld [vmem:[%s2444_s1 + $0x168] sm:$0xff]   ;;  %p1951_p4 = pnand %p1950_p3, %p1944_p0 }
  0x4f   :  { %v1913_v56 = vld [vmem:[%s2444_s1 + $0x160] sm:$0xff]   ;;  %v1918_v59 = vld [vmem:[%s2444_s1 + $0x128] sm:$0xff]   ;;  %v1921_v60 = vld [vmem:[%s2444_s1 + $0x170] sm:$0xff]  }
  0x50   :  { %1720 = vmatpush3.bf16.msra.mxu1 %v1884_v31  ;;  %v1914_v57 = vld [vmem:[%s2444_s1 + $0x120] sm:$0xff]   ;;  %v1922_v61 = vld [vmem:[%s2444_s1 + $0x130] sm:$0xff]   ;;  %v1925_v62 = vld [vmem:[%s2444_s1 + $0x178] sm:$0xff]  }
  0x51   :  { %1721 = vmatprep.subr.bf16.mxu1 %v1885_v32  ;;  %v1926_v63 = vld [vmem:[%s2444_s1 + $0x138] sm:$0xff]   ;;  %v1899_v27 = vld [vmem:[%s2444_s1 + $0xc8] sm:$0xff]   ;;  %v1903_v29 = vld [vmem:[%s2444_s1 + $0xd0] sm:$0xff]  }
  0x52   :  { %v1900_v28 = vld [vmem:[%s2444_s1 + $0x88] sm:$0xff]   ;;  %v1904_v30 = vld [vmem:[%s2444_s1 + $0x90] sm:$0xff]   ;;  %v1907_v31 = vld [vmem:[%s2444_s1 + $0xd8] sm:$0xff]  }
  0x53   :  { %v1911_v32 = vld [vmem:[%s2444_s1 + $0xe0] sm:$0xff]   ;;  %v1929_v42 = vld [vmem:[%s2444_s1 + $0x1c8] sm:$0xff]   ;;  %v1931_v44 = vld [vmem:[%s2444_s1 + $0x1d0] sm:$0xff]  }
  0x54   :  { %1722 = vmatpush3.bf16.msra.mxu1 %v1886_v33  ;;  %v1912_v33 = vld [vmem:[%s2444_s1 + $0xa0] sm:$0xff]   ;;  %v1930_v43 = vld [vmem:[%s2444_s1 + $0x188] sm:$0xff]   ;;  %v1932_v45 = vld [vmem:[%s2444_s1 + $0x190] sm:$0xff]  }
  0x55   :  { %1723 = vmatprep.subr.bf16.mxu1 %v1887_v34  ;;  %v1915_v34 = vld [vmem:[%s2444_s1 + $0xe8] sm:$0xff]  }
  0x58   :  { %1724 = vmatpush3.bf16.msra.mxu1 %v1888_v35  ;;  %v1916_v35 = vld [vmem:[%s2444_s1 + $0xa8] sm:$0xff]  }
  0x59   :  { %1725 = vmatprep.subr.bf16.mxu1 %v1889_v36  ;;  %v1919_v36 = vld [vmem:[%s2444_s1 + $0xf0] sm:$0xff]  }
  0x5c   :  { %1726 = vmatpush3.bf16.msra.mxu1 %v1890_v37  ;;  %v1920_v37 = vld [vmem:[%s2444_s1 + $0xb0] sm:$0xff]  }
  0x5d   :  { %1727 = vmatprep.subr.bf16.mxu1 %v1891_v38  ;;  %v1923_v38 = vld [vmem:[%s2444_s1 + $0xf8] sm:$0xff]  }
  0x60   :  { %1728 = vmatpush3.bf16.msra.mxu1 %v1892_v39  ;;  %v1924_v39 = vld [vmem:[%s2444_s1 + $0xb8] sm:$0xff]  }
  0x61   :  { %1729 = vmatprep.subr.bf16.mxu1 %v1893_v40  ;;  %v1927_v40 = vld [vmem:[%s2444_s1 + $0x1c0] sm:$0xff]  }
  0x64   :  { %1730 = vmatpush3.bf16.msra.mxu1 %v1894_v41  ;;  %v1928_v41 = vld [vmem:[%s2444_s1 + $0x180] sm:$0xff]  }
  0x65   :  { %1759 = vmatprep.subr.bf16.mxu1 %v1897_v46  ;;  %v1935_v46 = vld [vmem:[%s2444_s1 + $0x1e0] sm:$0xff]  }
  0x67   :  { %1343 = vmatmul.mubr.bf16.vlgmr.msra.gmra.mrb[8].mxu1 %v2113_v47  ;;  %v1901_v47 = vld [vmem:[%s2444_s1 + $0x148] sm:$0xff]  }
  0x68   :  { %1422 = vmatprep.mubr.bf16.mxu1 %v73_v21  ;;  %1760 = vmatpush3.bf16.msra.mxu1 %v1898_v49  ;;  %v1936_v49 = vld [vmem:[%s2444_s1 + $0x1a0] sm:$0xff]  }
  0x69   :  { %1761 = vmatprep.subr.bf16.mxu1 %v1901_v47  ;;  %v1937_v47 = vld [vmem:[%s2444_s1 + $0x1e8] sm:$0xff]  }
  0x6c   :  { %1762 = vmatpush3.bf16.msra.mxu1 %v1902_v50  ;;  %v1938_v50 = vld [vmem:[%s2444_s1 + $0x1a8] sm:$0xff]  }
  0x6d   :  { %1763 = vmatprep.subr.bf16.mxu1 %v1905_v52  ;;  %v1939_v52 = vld [vmem:[%s2444_s1 + $0x1f0] sm:$0xff]  }
  0x70   :  { %1764 = vmatpush3.bf16.msra.mxu1 %v1906_v53  ;;  %v1940_v53 = vld [vmem:[%s2444_s1 + $0x1b0] sm:$0xff]  }
  0x71   :  { %1765 = vmatprep.subr.bf16.mxu1 %v1909_v54  ;;  %v1941_v54 = vld [vmem:[%s2444_s1 + $0x1f8] sm:$0xff]  }
  0x74   :  { %1766 = vmatpush3.bf16.msra.mxu1 %v1910_v55  ;;  %v1942_v55 = vld [vmem:[%s2444_s1 + $0x1b8] sm:$0xff]  }
  0x75   :  { %1767 = vmatprep.subr.bf16.mxu1 %v1913_v56 }
  0x78   :  { %1768 = vmatpush3.bf16.msra.mxu1 %v1914_v57 }
  0x79   :  { %1769 = vmatprep.subr.bf16.mxu1 %v1917_v58 }
  0x7c   :  { %1770 = vmatpush3.bf16.msra.mxu1 %v1918_v59 }
  0x7d   :  { %1771 = vmatprep.subr.bf16.mxu1 %v1921_v60 }
  0x80   :  { %1772 = vmatpush3.bf16.msra.mxu1 %v1922_v61 }
  0x81   :  { %1773 = vmatprep.subr.bf16.mxu1 %v1925_v62 }
  0x84   :  { %1774 = vmatpush3.bf16.msra.mxu1 %v1926_v63 }
  0x87   :  { %1423 = vmatmul.mubr.bf16.vlgmr.msra.gmra.mrb[12].mxu1 %v2220_v24  ;;  %v1896_v24 = vld [vmem:[%s2444_s1 + $0x80] sm:$0xff]  }
  0xf6   :  { %v1641_v0 = vpop.f32.mrb[0].mxu0 }
  0xf7   :  { %v1663_v1 = vpop.f32.mrb[0].mxu1  ;;  %v1642_v2 = vpop.f32.mrb[1].mxu0 }
  0xf8   :  { %v1664_v3 = vpop.f32.mrb[1].mxu1  ;;  %v1643_v4 = vadd.f32 %v1642_v2, %v1641_v0  ;;  %v1644_v6 = vpop.f32.mrb[2].mxu0 }
  0xf9   :  { %v1665_v5 = vadd.f32 %v1664_v3, %v1663_v1  ;;  %v1666_v7 = vpop.f32.mrb[2].mxu1  ;;  %v1645_v8 = vpop.f32.mrb[3].mxu0 }
  0xfa   :  { %v1667_v9 = vpop.f32.mrb[3].mxu1 }
  0xfb   :  { %v791_v10 = vadd.f32 %v1665_v5, %v1643_v4 }
 0x116   :  { %v1685_v11 = vpop.f32.mrb[4].mxu0 }
 0x117   :  { %v1707_v12 = vpop.f32.mrb[4].mxu1  ;;  %v1686_v13 = vpop.f32.mrb[5].mxu0 }
 0x118   :  { %v1708_v14 = vpop.f32.mrb[5].mxu1  ;;  %v1687_v15 = vadd.f32 %v1686_v13, %v1685_v11  ;;  %v1688_v17 = vpop.f32.mrb[6].mxu0 }
 0x119   :  { %v1709_v16 = vadd.f32 %v1708_v14, %v1707_v12  ;;  %v1710_v18 = vpop.f32.mrb[6].mxu1  ;;  %v1689_v19 = vpop.f32.mrb[7].mxu0 }
 0x11a   :  { %v1711_v20 = vpop.f32.mrb[7].mxu1  ;;  %v831_v21 = vadd.f32 %v1687_v15, %v791_v10  ;;  %v1624_v18 = vld [vmem:[%s2447_s4] ss:$0 sm:$0xff] }
 0x11c   :  { %v871_v22 = vadd.f32 %v1709_v16, %v831_v21 }
 0x11e   :  { %v876_v26 = vpack.c.bf16 %v871_v22, %v871_v22 }
 0x120   :  { %1806 = vmatmul.mubr.msk.bf16.vlgmr.msra.gmra.mrb[8].mxu0 %vm878_vm2, %v876_v26 }
 0x121   :  { %1738 = vmatpush3.bf16.msra.mxu0 %v1896_v24  ;;  %1382 = vmatprep.mubr.bf16.mxu0 %v2122_v51  ;;  %v1908_v51 = vld [vmem:[%s2444_s1 + $0x98] sm:$0xff]  }
 0x122   :  { %1739 = vmatprep.subr.bf16.mxu0 %v1899_v27 }
 0x125   :  { %1740 = vmatpush3.bf16.msra.mxu0 %v1900_v28 }
 0x126   :  { %1741 = vmatprep.subr.bf16.mxu0 %v1903_v29 }
 0x129   :  { %1742 = vmatpush3.bf16.msra.mxu0 %v1904_v30 }
 0x12a   :  { %1743 = vmatprep.subr.bf16.mxu0 %v1907_v31 }
 0x12d   :  { %1744 = vmatpush3.bf16.msra.mxu0 %v1908_v51 }
 0x12e   :  { %1745 = vmatprep.subr.bf16.mxu0 %v1911_v32 }
 0x131   :  { %1746 = vmatpush3.bf16.msra.mxu0 %v1912_v33 }
 0x132   :  { %1747 = vmatprep.subr.bf16.mxu0 %v1915_v34 }
 0x135   :  { %1748 = vmatpush3.bf16.msra.mxu0 %v1916_v35 }
 0x136   :  { %1749 = vmatprep.subr.bf16.mxu0 %v1919_v36 }
 0x139   :  { %1750 = vmatpush3.bf16.msra.mxu0 %v1920_v37 }
 0x13a   :  { %1751 = vmatprep.subr.bf16.mxu0 %v1923_v38  ;;  %v1731_v56 = vpop.f32.mrb[8].mxu1 }
 0x13b   :  { %v1732_v57 = vpop.f32.mrb[9].mxu1 }
 0x13c   :  { %v1733_v58 = vadd.f32 %v1732_v57, %v1731_v56  ;;  %v1734_v59 = vpop.f32.mrb[10].mxu1 }
 0x13d   :  { %1752 = vmatpush3.bf16.msra.mxu0 %v1924_v39  ;;  %v1735_v60 = vpop.f32.mrb[11].mxu1 }
 0x13e   :  { %1781 = vmatprep.subr.bf16.mxu0 %v1927_v40 }
 0x140   :  { %1383 = vmatmul.mubr.bf16.vlgmr.msra.gmra.mrb[12].mxu0 %v2115_v48  ;;  %v1933_v48 = vld [vmem:[%s2444_s1 + $0x1d8] sm:$0xff]  }
 0x141   :  { %1782 = vmatpush3.bf16.msra.mxu0 %v1928_v41  ;;  %1462 = vmatprep.mubr.bf16.mxu0 %v2217_v23  ;;  %v1934_v23 = vld [vmem:[%s2444_s1 + $0x198] sm:$0xff]  }
 0x142   :  { %1783 = vmatprep.subr.bf16.mxu0 %v1929_v42 }
 0x145   :  { %1784 = vmatpush3.bf16.msra.mxu0 %v1930_v43 }
 0x146   :  { %1785 = vmatprep.subr.bf16.mxu0 %v1931_v44 }
 0x149   :  { %1786 = vmatpush3.bf16.msra.mxu0 %v1932_v45 }
 0x14a   :  { %1787 = vmatprep.subr.bf16.mxu0 %v1933_v48 }
 0x14d   :  { %1788 = vmatpush3.bf16.msra.mxu0 %v1934_v23 }
 0x14e   :  { %1789 = vmatprep.subr.bf16.mxu0 %v1935_v46 }
 0x151   :  { %1790 = vmatpush3.bf16.msra.mxu0 %v1936_v49 }
 0x152   :  { %1791 = vmatprep.subr.bf16.mxu0 %v1937_v47 }
 0x155   :  { %1792 = vmatpush3.bf16.msra.mxu0 %v1938_v50 }
 0x156   :  { %1793 = vmatprep.subr.bf16.mxu0 %v1939_v52 }
 0x159   :  { %1794 = vmatpush3.bf16.msra.mxu0 %v1940_v53 }
 0x15a   :  { %1795 = vmatprep.subr.bf16.mxu0 %v1941_v54  ;;  %v1775_v61 = vpop.f32.mrb[12].mxu1 }
 0x15b   :  { %v1776_v62 = vpop.f32.mrb[13].mxu1 }
 0x15c   :  { %v1777_v63 = vadd.f32 %v1776_v62, %v1775_v61  ;;  %v1778_v0 = vpop.f32.mrb[14].mxu1 }
 0x15d   :  { %1796 = vmatpush3.bf16.msra.mxu0 %v1942_v55  ;;  %v1779_v1 = vpop.f32.mrb[15].mxu1 }
 0x160   :  { %1463 = vmatmul.mubr.bf16.vlgmr.msra.gmra.mrb[16].mxu0 %v2222_v25 }
 0x1f3   :  { %v920_v2 = vpop.f32.mrb[8].mxu0 }
 0x1f4   :  { %v1345_v3 = vadd.f32 %v1733_v58, %v920_v2  ;;  %v1807_v4 = vpop.f32.mrb[9].mxu0 }
 0x1f5   :  { %v923_v5 = vpop.f32.mrb[10].mxu0 }
 0x1f6   :  { %v1808_v6 = vpop.f32.mrb[11].mxu0 }
 0x213   :  { %v1753_v7 = vpop.f32.mrb[12].mxu0 }
 0x214   :  { %v1754_v8 = vpop.f32.mrb[13].mxu0 }
 0x215   :  { %v1755_v9 = vadd.f32 %v1754_v8, %v1753_v7  ;;  %v1756_v10 = vpop.f32.mrb[14].mxu0 }
 0x216   :  { %v1757_v25 = vpop.f32.mrb[15].mxu0 }
 0x217   :  { %v1385_v11 = vadd.f32 %v1755_v9, %v1345_v3 }
 0x219   :  { %v1425_v12 = vadd.f32 %v1777_v63, %v1385_v11 }
 0x233   :  { %v1797_v13 = vpop.f32.mrb[16].mxu0 }
 0x234   :  { %v1798_v14 = vpop.f32.mrb[17].mxu0 }
 0x235   :  { %v1799_v15 = vadd.f32 %v1798_v14, %v1797_v13  ;;  %v1800_v16 = vpop.f32.mrb[18].mxu0 }
 0x236   :  { %v1801_v17 = vpop.f32.mrb[19].mxu0 }
 0x237   :  { %v1465_v19 = vadd.f32 %v1799_v15, %v1425_v12 }
 0x239   :  { %v1477_v20 = vadd.f32 %v1624_v18, %v1465_v19 }
 0x23b   :  { %v1478_v21 = vmax.f32 %v1477_v20, 0.0 }
 0x23d   :  { %1480 = vst.msk [vmem:[#allocation2] sm:$0x3] %vm1479_vm3, %v1478_v21 }
 0x23e   :  { %1954 = shalt.err (!%p1951_p4)
}
 0x23f   :  { %s1955_s21 = scalar_lea.hbm %s2448_s5, 32 }
 0x240   :  { %p1956_p5 = scmp.ne.s32.totalorder %s2448_s5, %s1955_s21  ;;  %p1959_p6 = scmp.lt.u32.totalorder %s1955_s21, %s2448_s5 }
 0x242   :  { %p1961_p7 = pnand %p1959_p6, %p1956_p5 }
 0x244   :  { %1964 = shalt.err (!%p1961_p7)
}
 0x245   :  { %1490 = dma.vmem_to_hbm [thread:$0]  %s1488_s18, 32, %s2448_s5, [#allocation3]  }
 0x246   :  { %1965 = dma.done.wait [#allocation3], 32  }
 0x247   :  { %1966 = vsyncadd [#allocation3], 4294967264 }
 0x248   :  { %1494 = vsyncpa [#allocation3], 1 }

</bundles_post_ra>
